<compile_context>
chip_gen: v7x
topology: tpu7x:2x2x1
jax: 0.10.0
libtpu: 0.0.40
codegen_flags: <defaults>
</compile_context>

<pallas_src>
import functools

import jax
import jax.numpy as jnp
from jax.experimental import pallas as pl
from jax.experimental.pallas import tpu as pltpu


# ----------------------------------------------------------------------------
# In-kernel helpers.
# ----------------------------------------------------------------------------
def _softmax_lastdim(scores):
    """Softmax over the last axis with an EXACT divide (probs sum to 1 at f32)."""
    m = jnp.max(scores, axis=-1, keepdims=True)
    e = jnp.exp(scores - m)
    return e / jnp.sum(e, axis=-1, keepdims=True)


def _finish_step(scores, enc, h, probs_ref, ctx_ref, hid_ref):
    """Softmax + fused context matmul + per-step writeback + hidden carry update."""
    probs = _softmax_lastdim(scores)                                   # (B, 1, L)
    ctx = jnp.einsum('bql,blh->bqh', probs, enc,
                     preferred_element_type=jnp.float32)               # (B, 1, H)
    probs_ref[...] = probs[None].astype(probs_ref.dtype)               # (1, B, 1, L)
    ctx_ref[...] = ctx[None].astype(ctx_ref.dtype)                     # (1, B, 1, H)
    # TODO(synk): the real chatbot decoder feeds the argmax token through an
    # embedding + GRU here; this tanh stand-in recurrence (matched by the reference)
    # gives the fused multi-step kernel a well-defined hidden-state carry.
    hid_ref[...] = jnp.tanh(h + ctx)


def _init_hidden(h0_ref, hid_ref):
    @pl.when(pl.program_id(0) == 0)
    def _():
        hid_ref[...] = h0_ref[...].astype(jnp.float32)


# ----------------------------------------------------------------------------
# Kernels (one per attention method). Grid is over decode steps t = 0..T-1.
# Every step sees hidden carry (B,1,H), resident enc (B,L,H) and writes the
# t-th slice of probs (T,B,1,L) and context (T,B,1,H).
# ----------------------------------------------------------------------------
def _dot_kernel(h0_ref, enc_ref, probs_ref, ctx_ref, hid_ref):
    _init_hidden(h0_ref, hid_ref)
    h = hid_ref[...]                                                   # (B, 1, H)
    enc = enc_ref[...]                                                 # (B, L, H)
    scores = jnp.einsum('bqh,blh->bql', h, enc,
                        preferred_element_type=jnp.float32)            # (B, 1, L)
    _finish_step(scores, enc, h, probs_ref, ctx_ref, hid_ref)


def _general_kernel(h0_ref, enc_ref, w_ref, b_ref, probs_ref, ctx_ref, hid_ref):
    _init_hidden(h0_ref, hid_ref)
    h = hid_ref[...]                                                   # (B, 1, H)
    enc = enc_ref[...]                                                 # (B, L, H)
    w = w_ref[...]                                                     # (H_out, H_in)
    b = b_ref[...]                                                     # (1, 1, H)
    B, _, H = h.shape
    # h . (enc W^T + b)  ==  (h W) . enc + h . b   -- avoids the (B,L,H) energy tensor.
    hw = jnp.dot(h.reshape(B, H), w,
                 preferred_element_type=jnp.float32)                   # (B, H_in)
    hb = jnp.sum(h * b, axis=2, keepdims=True)                         # (B, 1, 1)
    scores = jnp.einsum('bqh,blh->bql', hw[:, None, :], enc,
                        preferred_element_type=jnp.float32) + hb       # (B, 1, L)
    _finish_step(scores, enc, h, probs_ref, ctx_ref, hid_ref)


def _concat_kernel(h0_ref, enc_ref, wh_t_ref, we_t_ref, b_ref, v_ref,
                   probs_ref, ctx_ref, hid_ref):
    _init_hidden(h0_ref, hid_ref)
    h = hid_ref[...]                                                   # (B, 1, H)
    enc = enc_ref[...]                                                 # (B, L, H)
    wh_t = wh_t_ref[...]                                               # (H, H) = W[:, :H].T
    we_t = we_t_ref[...]                                               # (H, H) = W[:, H:].T
    b = b_ref[...]                                                     # (1, 1, H)
    v = v_ref[...]                                                     # (1, 1, H)
    B, L, H = enc.shape
    # cat((hidden, enc), -1) @ W^T  ==  h @ Wh^T + enc @ We^T  (split/T hoisted to host)
    eh = jnp.dot(h.reshape(B, H), wh_t,
                 preferred_element_type=jnp.float32)                   # (B, H)
    ee = jnp.dot(enc.reshape(B * L, H), we_t,
                 preferred_element_type=jnp.float32)                   # (B*L, H)
    energy = jnp.tanh(eh[:, None, :] + ee.reshape(B, L, H) + b)        # (B, L, H)
    v_b = jnp.broadcast_to(v.astype(jnp.float32), (B, 1, H))
    scores = jnp.einsum('bqh,blh->bql', v_b, energy,
                        preferred_element_type=jnp.float32)            # (B, 1, L)
    _finish_step(scores, enc, h, probs_ref, ctx_ref, hid_ref)


# ----------------------------------------------------------------------------
# Loop-invariant preparation (done ONCE, outside the greedy decode loop).
# ----------------------------------------------------------------------------
def prepare_encoder_outputs(encoder_outputs):
    """(L, B, H) PyTorch layout -> (B, L, H). Call once per input sequence."""
    return jnp.transpose(encoder_outputs, (1, 0, 2))


def prepare_params(method, params):
    """One-time weight split / transpose / bias reshape hoisted off the decode loop."""
    if method == 'dot':
        return {}
    H = params['attn_w'].shape[0]
    if method == 'general':
        return {'w': params['attn_w'],                                  # (H_out, H_in)
                'b': params['attn_b'].reshape(1, 1, H)}
    if method == 'concat':
        w = params['attn_w']                                            # (H, 2H)
        return {'wh_t': jnp.transpose(w[:, :H]),                        # (H, H)
                'we_t': jnp.transpose(w[:, H:]),                        # (H, H)
                'b': params['attn_b'].reshape(1, 1, H),
                'v': params['v'].reshape(1, 1, H)}
    raise ValueError(method, 'is not an appropriate attention method.')


# ----------------------------------------------------------------------------
# One fused decode RUN: all T attention + context steps in a single pallas_call.
# ----------------------------------------------------------------------------
def greedy_attn_decode(method, num_steps, prepared, hidden, enc_blh):
    """hidden: (1, B, H); enc_blh: (B, L, H) ->
       probs (T, B, 1, L), context (T, B, 1, H) for T = num_steps decode steps."""
    B, L, H = enc_blh.shape
    h3 = hidden.reshape(B, 1, H)     # leading dim is 1 -> pure reshape, no data movement

    bsp = pl.BlockSpec
    const3 = lambda t: (0, 0, 0)     # loop-invariant: block index never changes => 1 DMA
    const2 = lambda t: (0, 0)
    step4 = lambda t: (t, 0, 0, 0)   # per-step output slice

    in_arrays = [h3, enc_blh]
    in_specs = [bsp((B, 1, H), const3), bsp((B, L, H), const3)]
    if method == 'dot':
        kernel = _dot_kernel
    elif method == 'general':
        kernel = _general_kernel
        in_arrays += [prepared['w'], prepared['b']]
        in_specs += [bsp((H, H), const2), bsp((1, 1, H), const3)]
    elif method == 'concat':
        kernel = _concat_kernel
        in_arrays += [prepared['wh_t'], prepared['we_t'], prepared['b'], prepared['v']]
        in_specs += [bsp((H, H), const2), bsp((H, H), const2),
                     bsp((1, 1, H), const3), bsp((1, 1, H), const3)]
    else:
        raise ValueError(method, 'is not an appropriate attention method.')

    probs, context = pl.pallas_call(
        kernel,
        grid=(num_steps,),
        in_specs=in_specs,
        out_specs=(bsp((1, B, 1, L), step4), bsp((1, B, 1, H), step4)),
        out_shape=(jax.ShapeDtypeStruct((num_steps, B, 1, L), jnp.float32),
                   jax.ShapeDtypeStruct((num_steps, B, 1, H), jnp.float32)),
        scratch_shapes=[pltpu.VMEM((B, 1, H), jnp.float32)],            # hidden carry
        compiler_params=pltpu.CompilerParams(
            dimension_semantics=('arbitrary',)),                        # sequential carry
    )(*in_arrays)
    return probs, context


# ----------------------------------------------------------------------------
# Pure-JAX reference (mirrors the PyTorch decoder step) for correctness checks.
# ----------------------------------------------------------------------------
def attn_reference(method, params, hidden, encoder_outputs):
    if method == 'dot':
        scores = jnp.sum(hidden * encoder_outputs, axis=2)                   # (L, B)
    elif method == 'general':
        energy = encoder_outputs @ params['attn_w'].T + params['attn_b']
        scores = jnp.sum(hidden * energy, axis=2)
    elif method == 'concat':
        L = encoder_outputs.shape[0]
        hexp = jnp.broadcast_to(hidden, (L,) + hidden.shape[1:])
        cat = jnp.concatenate([hexp, encoder_outputs], axis=2)
        energy = jnp.tanh(cat @ params['attn_w'].T + params['attn_b'])
        scores = jnp.sum(params['v'] * energy, axis=2)
    else:
        raise ValueError(method)
    probs = jax.nn.softmax(scores.T, axis=1)[:, None, :]                     # (B, 1, L)
    context = jnp.einsum('bql,lbh->bqh', probs, encoder_outputs)             # (B, 1, H)
    return probs, context


if __name__ == '__main__':
    B, L, H = 2, 8, 32
    DECODE_STEPS = 4          # stand-in for GreedySearchDecoder's max_length loop
    VOCAB = 16                # tiny stand-in vocab for the greedy argmax demo

    key = jax.random.PRNGKey(0)
    k_h, k_e, k_w1, k_b1, k_w2, k_b2, k_v, k_o = jax.random.split(key, 8)

    hidden0 = jax.random.normal(k_h, (1, B, H), dtype=jnp.float32)
    encoder_outputs = jax.random.normal(k_e, (L, B, H), dtype=jnp.float32)
    out_proj = jax.random.normal(k_o, (VOCAB, H), dtype=jnp.float32) * 0.1

    raw_params = {
        'dot': {},
        # 'general': nn.Linear(H, H)
        'general': {
            'attn_w': jax.random.normal(k_w1, (H, H), dtype=jnp.float32) * 0.1,
            'attn_b': jax.random.normal(k_b1, (H,), dtype=jnp.float32) * 0.1,
        },
        # 'concat': nn.Linear(2H, H) + v Parameter(H)
        'concat': {
            'attn_w': jax.random.normal(k_w2, (H, 2 * H), dtype=jnp.float32) * 0.1,
            'attn_b': jax.random.normal(k_b2, (H,), dtype=jnp.float32) * 0.1,
            'v': jax.random.normal(k_v, (H,), dtype=jnp.float32) * 0.1,
        },
    }

    # Loop-invariant prep: one transpose per sequence, NOT per decode step.
    enc_blh = prepare_encoder_outputs(encoder_outputs)

    ATOL = RTOL = 2e-3

    for method in ('dot', 'general', 'concat'):
        prepared = prepare_params(method, raw_params[method])
        decode = jax.jit(functools.partial(greedy_attn_decode, method, DECODE_STEPS))

        # ONE kernel launch for all decode steps (no per-token host<->device sync).
        probs_all, ctx_all = decode(prepared, hidden0, enc_blh)
        probs_all = jax.block_until_ready(probs_all)
        ctx_all = jax.block_until_ready(ctx_all)

        assert probs_all.shape == (DECODE_STEPS, B, 1, L), (method, probs_all.shape)
        assert ctx_all.shape == (DECODE_STEPS, B, 1, H), (method, ctx_all.shape)

        # Independent pure-JAX reference replaying the same per-step recurrence.
        hidden = hidden0
        for t in range(DECODE_STEPS):
            ref_p, ref_c = attn_reference(method, raw_params[method], hidden,
                                          encoder_outputs)
            assert jnp.allclose(probs_all[t], ref_p, atol=ATOL, rtol=RTOL), (method, t)
            assert jnp.allclose(ctx_all[t], ref_c, atol=ATOL, rtol=RTOL), (method, t)
            assert jnp.allclose(jnp.sum(probs_all[t], axis=2), 1.0, atol=1e-3), (method, t)
            # Same stand-in recurrence the kernel applies to its VMEM hidden carry.
            hidden = jnp.tanh(hidden + ref_c.reshape(1, B, H))

        # Stand-in for GreedySearchDecoder's output projection + per-step greedy argmax
        # (all_tokens / all_scores); left in plain JAX/XLA -- see TODO(synk) above.
        logits = jnp.einsum('tbqh,vh->tbqv', ctx_all, out_proj)               # (T,B,1,V)
        all_scores = jnp.max(logits, axis=-1)[:, 0, 0]                        # (T,)
        all_tokens = jnp.argmax(logits, axis=-1)[:, 0, 0]                     # (T,)
        assert all_tokens.shape == (DECODE_STEPS,) and all_scores.shape == (DECODE_STEPS,)

    print('KERNEL_OK')
</pallas_src>

<mosaic_0001>
module attributes {stable_mosaic.version = 11 : i64} {
  func.func @_dot_kernel(%arg0: i32, %arg1: memref<2x1x32xf32, #tpu.memory_space<vmem>>, %arg2: memref<2x8x32xf32, #tpu.memory_space<vmem>>, %arg3: memref<1x2x1x8xf32, #tpu.memory_space<vmem>>, %arg4: memref<1x2x1x32xf32, #tpu.memory_space<vmem>>, %arg5: memref<2x1x32xf32, #tpu.memory_space<vmem>>) attributes {dimension_semantics = [#tpu.dimension_semantics<arbitrary>], iteration_bounds = array<i64: 4>, scalar_prefetch = 0 : i64, scratch_operands = 1 : i64, tpu.core_type = #tpu.core_type<tc>, window_params = [{pipeline_mode = #tpu.pipeline_mode<synchronous>, transform_indices = @transform_0, window_bounds = array<i64: 2, 1, 32>}, {pipeline_mode = #tpu.pipeline_mode<synchronous>, transform_indices = @transform_1, window_bounds = array<i64: 2, 8, 32>}, {transform_indices = @transform_2, window_bounds = array<i64: 1, 2, 1, 8>}, {transform_indices = @transform_3, window_bounds = array<i64: 1, 2, 1, 32>}]} {
    %c0_i32 = arith.constant 0 : i32
    %0 = arith.cmpi eq, %arg0, %c0_i32 : i32
    %1 = arith.extui %0 : i1 to i32
    %c0_i32_0 = arith.constant 0 : i32
    %2 = arith.cmpi ne, %1, %c0_i32_0 : i32
    scf.if %2 {
      %c0_20 = arith.constant 0 : index
      %c0_21 = arith.constant 0 : index
      %c0_22 = arith.constant 0 : index
      %23 = vector.load %arg1[%c0_20, %c0_21, %c0_22] : memref<2x1x32xf32, #tpu.memory_space<vmem>>, vector<2x1x32xf32>
      %c0_23 = arith.constant 0 : index
      %c0_24 = arith.constant 0 : index
      %c0_25 = arith.constant 0 : index
      %24 = vector.load %arg5[%c0_23, %c0_24, %c0_25] : memref<2x1x32xf32, #tpu.memory_space<vmem>>, vector<2x1x32xf32>
      tpu.vector_store %arg5[%c0_23, %c0_24, %c0_25], %23 {strides = array<i32>} : memref<2x1x32xf32, #tpu.memory_space<vmem>>, vector<2x1x32xf32>,
    } else {
    }
    %c0 = arith.constant 0 : index
    %c0_1 = arith.constant 0 : index
    %c0_2 = arith.constant 0 : index
    %3 = vector.load %arg5[%c0, %c0_1, %c0_2] : memref<2x1x32xf32, #tpu.memory_space<vmem>>, vector<2x1x32xf32>
    %c0_3 = arith.constant 0 : index
    %c0_4 = arith.constant 0 : index
    %c0_5 = arith.constant 0 : index
    %4 = vector.load %arg2[%c0_3, %c0_4, %c0_5] : memref<2x8x32xf32, #tpu.memory_space<vmem>>, vector<2x8x32xf32>
    "tpu.trace_start"() <{level = 10 : i32, message = "bqh,blh->bql"}> : () -> ()
    %cst = arith.constant dense<0.000000e+00> : vector<2x1x8xf32>
    %5 = tpu.matmul %3, %4, %cst {dimension_numbers = #tpu.dot_dimension_numbers<[2], [2], [1], [1], [0, 0, 0, 1, 1, 1], [0], [0]>} : vector<2x1x32xf32>, vector<2x8x32xf32>, vector<2x1x8xf32> -> vector<2x1x8xf32>
    "tpu.trace_stop"() : () -> ()
    %cst_6 = arith.constant dense<0xFF800000> : vector<2x1xf32>
    %6 = vector.multi_reduction <maximumf>, %5, %cst_6 [2] : vector<2x1x8xf32> to vector<2x1xf32>
    %7 = vector.shape_cast %6 : vector<2x1xf32> to vector<2x1x1xf32>
    %8 = vector.broadcast %7 : vector<2x1x1xf32> to vector<2x1x8xf32>
    %9 = arith.subf %5, %8 : vector<2x1x8xf32>
    %10 = math.exp %9 : vector<2x1x8xf32>
    %cst_7 = arith.constant dense<0.000000e+00> : vector<2x1xf32>
    %11 = vector.multi_reduction <add>, %10, %cst_7 [2] : vector<2x1x8xf32> to vector<2x1xf32>
    %12 = vector.shape_cast %11 : vector<2x1xf32> to vector<2x1x1xf32>
    %13 = vector.broadcast %12 : vector<2x1x1xf32> to vector<2x1x8xf32>
    %14 = arith.divf %10, %13 : vector<2x1x8xf32>
    "tpu.trace_start"() <{level = 10 : i32, message = "bql,blh->bqh"}> : () -> ()
    %cst_8 = arith.constant dense<0.000000e+00> : vector<2x1x32xf32>
    %15 = tpu.matmul %14, %4, %cst_8 {dimension_numbers = #tpu.dot_dimension_numbers<[2], [1], [1], [2], [0, 0, 0, 1, 1, 2], [0], [0]>} : vector<2x1x8xf32>, vector<2x8x32xf32>, vector<2x1x32xf32> -> vector<2x1x32xf32>
    "tpu.trace_stop"() : () -> ()
    %16 = vector.shape_cast %14 : vector<2x1x8xf32> to vector<1x2x1x8xf32>
    %c0_9 = arith.constant 0 : index
    %c0_10 = arith.constant 0 : index
    %c0_11 = arith.constant 0 : index
    %c0_12 = arith.constant 0 : index
    %17 = vector.load %arg3[%c0_9, %c0_10, %c0_11, %c0_12] : memref<1x2x1x8xf32, #tpu.memory_space<vmem>>, vector<1x2x1x8xf32>
    tpu.vector_store %arg3[%c0_9, %c0_10, %c0_11, %c0_12], %16 {strides = array<i32>} : memref<1x2x1x8xf32, #tpu.memory_space<vmem>>, vector<1x2x1x8xf32>,
    %18 = vector.shape_cast %15 : vector<2x1x32xf32> to vector<1x2x1x32xf32>
    %c0_13 = arith.constant 0 : index
    %c0_14 = arith.constant 0 : index
    %c0_15 = arith.constant 0 : index
    %c0_16 = arith.constant 0 : index
    %19 = vector.load %arg4[%c0_13, %c0_14, %c0_15, %c0_16] : memref<1x2x1x32xf32, #tpu.memory_space<vmem>>, vector<1x2x1x32xf32>
    tpu.vector_store %arg4[%c0_13, %c0_14, %c0_15, %c0_16], %18 {strides = array<i32>} : memref<1x2x1x32xf32, #tpu.memory_space<vmem>>, vector<1x2x1x32xf32>,
    %20 = arith.addf %3, %15 : vector<2x1x32xf32>
    %21 = math.tanh %20 : vector<2x1x32xf32>
    %c0_17 = arith.constant 0 : index
    %c0_18 = arith.constant 0 : index
    %c0_19 = arith.constant 0 : index
    %22 = vector.load %arg5[%c0_17, %c0_18, %c0_19] : memref<2x1x32xf32, #tpu.memory_space<vmem>>, vector<2x1x32xf32>
    tpu.vector_store %arg5[%c0_17, %c0_18, %c0_19], %21 {strides = array<i32>} : memref<2x1x32xf32, #tpu.memory_space<vmem>>, vector<2x1x32xf32>,
    return
  }
  func.func @transform_0(%arg0: i32) -> (i32, i32, i32) {
    %c0_i32 = arith.constant 0 : i32
    %c0_i32_0 = arith.constant 0 : i32
    %c0_i32_1 = arith.constant 0 : i32
    %c0_i32_2 = arith.constant 0 : i32
    return %c0_i32, %c0_i32_0, %c0_i32_1 : i32, i32, i32
  }
  func.func @transform_1(%arg0: i32) -> (i32, i32, i32) {
    %c0_i32 = arith.constant 0 : i32
    %c0_i32_0 = arith.constant 0 : i32
    %c0_i32_1 = arith.constant 0 : i32
    %c0_i32_2 = arith.constant 0 : i32
    return %c0_i32, %c0_i32_0, %c0_i32_1 : i32, i32, i32
  }
  func.func @transform_2(%arg0: i32) -> (i32, i32, i32, i32) {
    %c0_i32 = arith.constant 0 : i32
    %c0_i32_0 = arith.constant 0 : i32
    %c0_i32_1 = arith.constant 0 : i32
    %c0_i32_2 = arith.constant 0 : i32
    return %arg0, %c0_i32, %c0_i32_0, %c0_i32_1 : i32, i32, i32, i32
  }
  func.func @transform_3(%arg0: i32) -> (i32, i32, i32, i32) {
    %c0_i32 = arith.constant 0 : i32
    %c0_i32_0 = arith.constant 0 : i32
    %c0_i32_1 = arith.constant 0 : i32
    %c0_i32_2 = arith.constant 0 : i32
    return %arg0, %c0_i32, %c0_i32_0, %c0_i32_1 : i32, i32, i32, i32
  }
}

</mosaic_0001>

<bundles_post_ra>
// kernel: greedy_attn_decode.1
= control target key start
LH: loop header
LB: loop body
LE: loop exit
PB: predicated region body
PF: predicated region fallthrough
CT: control target
= control target key end

     0   :  { %9 = vsyncpa [#allocation4], 0  ;;  %s1151_s0 = inlined_call_operand.vmem [shape: f32[2,1,32], index: 0, kind: input, shape index: {}]   ;;  %s1152_s1 = inlined_call_operand.hbm [shape: f32[2,8,32], index: 1, kind: input, shape index: {}]   ;;  %s1153_s2 = inlined_call_operand.hbm [shape: f32[4,2,1,8], index: 2, kind: output, shape index: {0}]   ;;  %s1154_s3 = inlined_call_operand.hbm [shape: f32[4,2,1,32], index: 3, kind: output, shape index: {1}]  }
   0x1   :  { %10 = vsyncpa [#allocation5], 0 }
   0x2   :  { %12 = vsyncpa [#allocation5 + $0x1], 0 }
   0x3   :  { %13 = vsyncpa [#allocation8], 0 }
   0x4   :  { %15 = vsyncpa [#allocation8 + $0x1], 0  ;;  %s933_s12 = smov 0   ;;  %s935_s13 = smov 0  }
   0x5   :  { %s937_s14 = smov 0   ;;  %s939_s15 = smov 0  }
   0x6 LB: > { %s954_s16 = sadd.s32 4294967295, %s902_s15   ;;  %s651_s17 = sadd.s32 4294967294, %s902_s15   ;;  %s902_s15 = sphi %s939_s15, %s1171_s15   ;;  %s898_s14 = sphi %s937_s14, %s1170_s14   ;;  %s894_s13 = sphi %s935_s13, %s1169_s13   ;;  %s890_s12 = sphi %s933_s12, %s1168_s12  }
   0x7   : > { %s958_s18 = sadd.s32 1, %s902_s15   ;;  %s70_s19 = sadd.s32 1, %s898_s14 }
   0x8   : > { %s67_s20 = ssub.s32 %s902_s15, %s958_s18  ;;  %p80_p0 = scmp.ne.s32.totalorder %s898_s14, %s894_s13 }
   0x9   : > { %p68_p1 = scmp.eq.s32.totalorder %s67_s20, 0  ;;  %p81_p2 = scmp.eq.s32.totalorder %s954_s16, 3 }
   0xa   : > { %p86_p3 = scmp.ne.s32.totalorder %s894_s13, %s890_s12  ;;  %p87_p4 = scmp.eq.s32.totalorder %s651_s17, 3 }
   0xb   : > { %s969_s21 = scalar_select %p68_p1, %s898_s14, %s70_s19  }
   0xc   : > { %p971_p5 = por %p81_p2, %p80_p0  ;;  %p975_p6 = por %p87_p4, %p86_p3 }
   0xd   : > { %p652_p7 = scmp.ge.s32.totalorder %s902_s15, 1  ;;  %p120_p8 = scmp.lt.s32.totalorder %s902_s15, 5 }
   0xe   : > { %s1158_s22 = scalar_select %p971_p5, 1, 0 }
   0xf   : > { %s1159_s23 = scalar_select %p975_p6, 1, 0 }
  0x10   : > { %p1155_p10 = scmp.eq.s32.totalorder %s954_s16, 0  ;;  %p983_p11 = pnand %p652_p7, %p120_p8 }
  0x11   : > { %s904_s25 = smov [#allocation3]   ;;  %s776_s30 = scalar_lea.hbm %s1152_s1, 256 }
  0x12   : > { %s1160_s24 = scalar_select %p983_p11, 1, 0 }
  0x13   : > { %s135_s26 = sshll.u32 %s904_s25, 4  ;;  %p711_p12 = pneg %p983_p11  ;;  %s136_s26 = int_to_ptr.vmem [resolvable:$true] %s135_s26 }
  0x14   : > { %p777_p0 = scmp.ne.s32.totalorder %s1152_s1, %s776_s30  ;;  %p783_p4 = scmp.lt.u32.totalorder %s776_s30, %s1152_s1 }
  0x15   : > { %p991_p13 = pnand %p1155_p10, %p711_p12 }
  0x17   : > { %p778_p1 = pneg %p991_p13 }
  0x19   : > { %p779_p2 = pnand %p778_p1, %p777_p0 }
  0x1b   : > { %p780_p3 = pneg %p779_p2 }
  0x1d   : > { %p785_p7 = pnand %p783_p4, %p780_p3 }
  0x1f   : > { %788 = shalt.err (!%p785_p7)
}
  0x20   : > { %s789_s8 = scalar_lea.vmem %s136_s26, 256  ;;  %p797_p10 = scmp.lt.s32.totalorder %s136_s26, %s136_s26 }
  0x21   : > { %p790_p8 = scmp.ne.s32.totalorder %s136_s26, %s789_s8  ;;  %p798_p6 = scmp.lt.s32.totalorder %s789_s8, %s789_s8 }
  0x23   : > { %p792_p12 = pnand %p790_p8, %p778_p1  ;;  %p799_p5 = por %p798_p6, %p797_p10 }
  0x25   : > { %p793_p9 = pneg %p792_p12 }
  0x27   : > { %p800_p11 = pnand %p799_p5, %p793_p9 }
  0x29   : > { %803 = shalt.err (!%p800_p11)
}
  0x2a   : > { %s905_s9 = smov 128   ;;  %s906_s10 = smov 8  }
  0x2b   : > { %714 = dma.hbm_to_vmem [thread:$0]  (!%p991_p13), %s1152_s1, 256, %s136_s26, [#allocation4], %s905_s9, %s905_s9, %s906_s10  }
  0x2c   : > { %p1162_p0 = scmp.ne.s32.totalorder %s1160_s24, 0 }
  0x2d   : > { %p1163_p2 = scmp.eq.s32.totalorder (!%p1162_p0), %s954_s16, 0 }
  0x2e   : > { %151 = sbr.rel (%p1162_p0) target bundleno = 836 (0x344), region = 28 }
  0x35   : > { %877 = dma.done.wait (%p1163_p2), [#allocation4], 256   ;;  %p1164_p1 = pmov %p1163_p2 }
  0x36   : > { %s1018_s19 = sand.u32 1, %s894_s13   ;;  %p1165_p5 = scmp.ne.s32.totalorder %s954_s16, 0 }
  0x37   : > { %879 = vsyncadd (%p1164_p1), [#allocation4], 4294967040  ;;  %s656_s20 = sshll.u32 %s1018_s19, 1  ;;  %v179_v0 = vld [vmem:[%s1151_s0] sm:$0x1] (!%p1165_p5)  ;;  %vm181_vm0 = vcmask (!%p1165_p5), 253952  }
  0x38   : > { %s1021_s25 = scalar_lea.vmem [#allocation6], %s656_s20  ;;  %s1023_s27 = scalar_lea.vmem [#allocation7], %s656_s20  ;;  %v180_v1 = vld [vmem:[%s1151_s0 + $0x1] sm:$0x1] (!%p1165_p5)  ;;  %182 = vst.msk [vmem:[#allocation2] sm:$0x1] (!%p1165_p5), %vm181_vm0, %v179_v0 }
  0x39   : > { %178 = sbr.rel (%p1165_p5) target bundleno = 64 (0x40), region = 36  ;;  %183 = vst.msk [vmem:[#allocation2 + $0x1] sm:$0x1] (!%p1165_p5), %vm181_vm0, %v180_v1 }
  0x40 PF: > { %v186_v2 = vld [vmem:[#allocation3] sm:$0xff]  ;;  %vm188_vm1 = vcmask 261120   ;;  %v907_v3 = vmov 0.0   ;;  %vm908_vm2 = vmmov 0   ;;  %v187_v4 = vld [vmem:[#allocation3 + $0x8] sm:$0xff]  ;;  %vm341_vm3 = vcmask 57344  }
  0x41   : > { %683 = vmatprep.subr.mxu0 %v907_v3  ;;  %685 = vmatprep.mubr.msk.f32.mxu0 %vm908_vm2, %v907_v3  ;;  %v1034_v5 = vld [vmem:[#allocation2] sm:$0x1]  ;;  %v1037_v6 = vld [vmem:[#allocation2 + $0x1] sm:$0x1]  ;;  %vm364_vm4 = vcmask 64512   ;;  %s673_s30 = sshll.u32 %s954_s16, 5 }
  0x42   : > { %684 = vmatpush3.xpose.msk.msra.mxu0 %vm188_vm1, %v186_v2  ;;  %688 = vmatprep.subr.mxu1 %v907_v3  ;;  %s541_s4 = sshll.u32 %s1021_s25, 4  ;;  %s1058_s7 = scalar_lea.hbm %s1153_s2, %s673_s30  ;;  %s1060_s4 = int_to_ptr.vmem [resolvable:$true] %s541_s4 }
  0x43   : > { %689 = vmatpush3.xpose.msk.msra.mxu1 %vm188_vm1, %v187_v4  ;;  %690 = vmatprep.mubr.msk.f32.mxu1 %vm908_vm2, %v907_v3  ;;  %s523_s8 = scalar_lea.sflag [#allocation5], %s1018_s19  ;;  %s804_s9 = scalar_lea.vmem %s1060_s4, 32 }
  0x44   : > { %693 = vmatprep.subr.mxu0 %v907_v3  ;;  %698 = vmatprep.subr.mxu1 %v907_v3  ;;  %p805_p6 = scmp.ne.s32.totalorder %s1060_s4, %s804_s9  ;;  %p1166_p9 = scmp.ne.s32.totalorder %s1158_s22, 0 }
  0x45   : > { %686 = vmatmul.mubr.msk.f32.vlgmr.msra.gmra.mrb[0].mxu0 %vm188_vm1, %v1034_v5  ;;  %s909_s10 = smov [#allocation6]  }
  0x46   : > { %691 = vmatmul.mubr.msk.f32.vlgmr.msra.gmra.mrb[0].mxu1 %vm188_vm1, %v1037_v6  ;;  %694 = vmatpush3.msra.mxu0 %v186_v2  ;;  %p806_p10 = pnand %p805_p6, %p1166_p9  ;;  %s808_s11 = sshll.u32 %s909_s10, 4  ;;  %s809_s11 = int_to_ptr.vmem [resolvable:$false] %s808_s11 }
  0x47   : > { %695 = vmatprep.mubr.msk.f32.mxu0 %vm908_vm2, %v907_v3  ;;  %699 = vmatpush3.msra.mxu1 %v187_v4  ;;  %s810_s17 = scalar_lea.vmem %s809_s11, 64  ;;  %p811_p13 = scmp.lt.s32.totalorder %s1060_s4, %s809_s11 }
  0x48   : > { %700 = vmatprep.mubr.msk.f32.mxu1 %vm908_vm2, %v907_v3  ;;  %p807_p11 = pneg %p806_p10  ;;  %p812_p3 = scmp.lt.s32.totalorder %s810_s17, %s804_s9 }
  0x4a   : > { %p813_p4 = por %p812_p3, %p811_p13 }
  0x4c   : > { %p814_p7 = pnand %p813_p4, %p807_p11 }
 0x118   : > { %v261_v7 = vpop.f32.mrb[0].mxu0 }
 0x119   : > { %v687_v8 = vpop.f32.mrb[1].mxu0  ;;  %v342_v9 = vsel %vm341_vm3, %v261_v7, -inf  ;;  %v337_v10 = vpop.f32.mrb[0].mxu1 }
 0x11a   : > { %343 = vmax.xlane.f32.xlu0 %v342_v9  ;;  %v692_v11 = vpop.f32.mrb[1].mxu1  ;;  %v345_v12 = vsel %vm341_vm3, %v337_v10, -inf }
 0x11e   : > { %346 = vmax.xlane.f32.xlu0 %v345_v12 }
 0x1a7   : > { %v344_v13 = vpop.xlane.xlu0 %343 }
 0x1a8   : > { %v348_v14 = vsub.f32 %v261_v7, %v344_v13 }
 0x1aa   : > { %v350_v15 = vmul.f32 1.442695, %v348_v14 }
 0x1ab   : > { %v347_v16 = vpop.xlane.xlu0 %346 }
 0x1ac   : > { %764 = vpow2.f32 %v350_v15  ;;  %v349_v17 = vsub.f32 %v337_v10, %v347_v16 }
 0x1ae   : > { %v352_v18 = vmul.f32 1.442695, %v349_v17 }
 0x1b0   : > { %766 = vpow2.f32 %v352_v18 }
 0x1b6   : > { %v765_v19 = vpop.eup %764 }
 0x1b7   : > { %v354_v20 = vsel %vm341_vm3, %v765_v19, 0.0 }
 0x1b8   : > { %355 = vadd.xlane.f32.xlu1 %v354_v20 }
 0x1ba   : > { %v767_v21 = vpop.eup %766 }
 0x1bb   : > { %v357_v22 = vsel %vm341_vm3, %v767_v21, 0.0 }
 0x1bc   : > { %358 = vadd.xlane.f32.xlu1 %v357_v22 }
 0x245   : > { %v356_v23 = vpop.xlane.xlu1 %355 }
 0x246   : > { %768 = vrcp.f32 %v356_v23 }
 0x249   : > { %v359_v24 = vpop.xlane.xlu1 %358 }
 0x24a   : > { %770 = vrcp.f32 %v359_v24 }
 0x250   : > { %v769_v25 = vpop.eup %768 }
 0x251   : > { %v361_v26 = vmul.f32 %v769_v25, %v765_v19 }
 0x253   : > { %511 = vst.msk [vmem:[%s1021_s25] sm:$0x1] %vm341_vm3, %v361_v26  ;;  %696 = vmatmul.mubr.msk.f32.vlgmr.msra.gmra.mrb[2].mxu0 %vm364_vm4, %v361_v26 }
 0x254   : > { %v771_v27 = vpop.eup %770 }
 0x255   : > { %v363_v28 = vmul.f32 %v771_v27, %v767_v21 }
 0x257   : > { %512 = vst.msk [vmem:[%s1021_s25 + $0x1] sm:$0x1] %vm341_vm3, %v363_v28  ;;  %701 = vmatmul.mubr.msk.f32.vlgmr.msra.gmra.mrb[2].mxu1 %vm364_vm4, %v363_v28 }
 0x258   : > { %817 = shalt.err (!%p814_p7)
}
 0x259   : > { %s818_s20 = scalar_lea.hbm %s1058_s7, 32  ;;  %s822_s26 = scalar_lea.hbm %s1153_s2, 128 }
 0x25a   : > { %p819_p8 = scmp.ne.s32.totalorder %s1058_s7, %s818_s20  ;;  %p823_p2 = scmp.lt.u32.totalorder %s1058_s7, %s1153_s2 }
 0x25b   : > { %p824_p1 = scmp.lt.u32.totalorder %s822_s26, %s818_s20  ;;  %p826_p6 = scmp.lt.u32.totalorder %s818_s20, %s1058_s7 }
 0x25c   : > { %p820_p12 = pnand %p819_p8, %p1166_p9 }
 0x25d   : > { %p825_p5 = por %p824_p1, %p823_p2 }
 0x25e   : > { %p821_p0 = pneg %p820_p12 }
 0x25f   : > { %p827_p10 = por %p826_p6, %p825_p5 }
 0x261   : > { %p828_p11 = pnand %p827_p10, %p821_p0 }
 0x263   : > { %831 = shalt.err (!%p828_p11)
}
 0x264   : > { %s910_s5 = smov 16   ;;  %s911_s6 = smov 1   ;;  %vm513_vm5 = vcmask 253952  }
 0x265   : > { %707 = dma.vmem_to_hbm [thread:$0]  (%p1166_p9), %s1060_s4, 32, %s1058_s7, %s523_s8, %s910_s5, %s910_s5, %s911_s6  }
 0x266   : > { %s557_s9 = sshll.u32 %s1023_s27, 4  ;;  %s1098_s17 = scalar_lea.hbm %s1154_s3, %s673_s30  ;;  %s1100_s9 = int_to_ptr.vmem [resolvable:$true] %s557_s9 }
 0x267   : > { %s528_s4 = scalar_lea.sflag [#allocation8], %s1018_s19  ;;  %s832_s7 = scalar_lea.vmem %s1100_s9, 32 }
 0x268   : > { %p833_p13 = scmp.ne.s32.totalorder %s1100_s9, %s832_s7  ;;  %s912_s16 = smov [#allocation7]  }
 0x269   : > { %s836_s30 = sshll.u32 %s912_s16, 4  ;;  %s837_s30 = int_to_ptr.vmem [resolvable:$false] %s836_s30 }
 0x26a   : > { %p834_p3 = pnand %p833_p13, %p1166_p9  ;;  %s838_s8 = scalar_lea.vmem %s837_s30, 64 }
 0x26b   : > { %p839_p7 = scmp.lt.s32.totalorder %s1100_s9, %s837_s30  ;;  %p840_p8 = scmp.lt.s32.totalorder %s838_s8, %s832_s7 }
 0x26c   : > { %p835_p4 = pneg %p834_p3 }
 0x26d   : > { %p841_p12 = por %p840_p8, %p839_p7 }
 0x26f   : > { %p842_p0 = pnand %p841_p12, %p835_p4 }
 0x326   : > { %v434_v29 = vpop.f32.mrb[2].mxu0 }
 0x327   : > { %514 = vst.msk [vmem:[%s1023_s27] sm:$0x1] %vm513_vm5, %v434_v29  ;;  %v516_v30 = vadd.f32 %v434_v29, %v1034_v5  ;;  %v697_v31 = vpop.f32.mrb[3].mxu0 }
 0x329   : > { %772 = vtanh.f32 %v516_v30 }
 0x32a   : > { %v507_v32 = vpop.f32.mrb[2].mxu1 }
 0x32b   : > { %515 = vst.msk [vmem:[%s1023_s27 + $0x1] sm:$0x1] %vm513_vm5, %v507_v32  ;;  %v517_v33 = vadd.f32 %v507_v32, %v1037_v6  ;;  %v702_v34 = vpop.f32.mrb[3].mxu1 }
 0x32c   : > { %845 = shalt.err (!%p842_p0)
}
 0x32d   : > { %s846_s27 = scalar_lea.hbm %s1098_s17, 32  ;;  %s850_s24 = scalar_lea.hbm %s1154_s3, 128 }
 0x32e   : > { %p847_p2 = scmp.ne.s32.totalorder %s1098_s17, %s846_s27  ;;  %p851_p6 = scmp.lt.u32.totalorder %s1098_s17, %s1154_s3 }
 0x32f   : > { %p852_p10 = scmp.lt.u32.totalorder %s850_s24, %s846_s27  ;;  %p854_p13 = scmp.lt.u32.totalorder %s846_s27, %s1098_s17 }
 0x330   : > { %p848_p1 = pnand %p847_p2, %p1166_p9 }
 0x331   : > { %p853_p11 = por %p852_p10, %p851_p6 }
 0x332   : > { %p849_p5 = pneg %p848_p1 }
 0x333   : > { %p855_p3 = por %p854_p13, %p853_p11 }
 0x335   : > { %p856_p4 = pnand %p855_p3, %p849_p5 }
 0x337   : > { %859 = shalt.err (!%p856_p4)
}
 0x338   : > { %708 = dma.vmem_to_hbm [thread:$0]  (%p1166_p9), %s1100_s9, 32, %s1098_s17, %s528_s4, %s910_s5, %s910_s5, %s911_s6   ;;  %774 = vtanh.f32 %v517_v33  ;;  %v773_v35 = vpop.eup %772 }
 0x339   : > { %520 = vst.msk [vmem:[#allocation2] sm:$0x1] %vm513_vm5, %v773_v35 }
 0x342   : > { %v775_v36 = vpop.eup %774 }
 0x343   : > { %521 = vst.msk [vmem:[#allocation2 + $0x1] sm:$0x1] %vm513_vm5, %v775_v36 }
 0x344 PF: > { %p724_p7 = scmp.ge.s32.totalorder %s902_s15, 2  ;;  %s572_s22 = sand.u32 1, %s890_s12  }
 0x345   : > { %p1167_p8 = scmp.ne.s32.totalorder %s1159_s23, 0  ;;  %s573_s29 = scalar_lea.sflag [#allocation5], %s572_s22 }
 0x347   : > { %p716_p12 = pnand %p724_p7, %p1167_p8 }
 0x349   : > { %881 = dma.done.wait (!%p716_p12), %s573_s29, 32  }
 0x34a   : > { %883 = vsyncadd (!%p716_p12), %s573_s29, 4294967264  ;;  %s582_s19 = scalar_lea.sflag [#allocation8], %s572_s22 }
 0x34b   : > { %885 = dma.done.wait (!%p716_p12), %s582_s19, 32  }
 0x34c   : > { %887 = vsyncadd (!%p716_p12), %s582_s19, 4294967264  ;;  %p18_p9 = scmp.ge.s32.totalorder %s958_s18, 6   ;;  %s1168_s12 = smov %s894_s13 }
 0x34d   : > { %s1169_s13 = smov %s898_s14  ;;  %s1170_s14 = smov %s969_s21 }
 0x34e   : > { %s1171_s15 = smov %s958_s18  ;;  %20 = sbr.rel (!%p18_p9) target bundleno = 6 (0x6), region = 86 }
 0x355   :  { %587 = vsyncpa [#allocation4], 1 }
 0x356   :  { %589 = vsyncpa [#allocation4 + $0x1], 1 }
 0x357   :  { %590 = vsyncpa [#allocation5], 1 }
 0x358   :  { %592 = vsyncpa [#allocation5 + $0x1], 1 }
 0x359   :  { %593 = vsyncpa [#allocation8], 1 }
 0x35a   :  { %595 = vsyncpa [#allocation8 + $0x1], 1 }

</bundles_post_ra>
